<compile_context>
chip_gen: v5e
topology: v5e:2x2
jax: 0.10.0
libtpu: 0.0.40
codegen_flags: <defaults>
</compile_context>

<pallas_src>
import jax
import jax.numpy as jnp
from jax.experimental import pallas as pl
from jax.experimental.pallas import tpu as pltpu


def _make_kernel(cn, psz):
    """Reduction kernel with the patch geometry baked in as Python constants."""

    def kernel(p_ref, o_ref, acc_ref):
        # p_ref:   (cn, cls, psz, psz)   -- patch row i of batch b
        # o_ref:   (cls, psz, W)         -- rows [i*psz,(i+1)*psz) of image b (W = cn*psz)
        # acc_ref: (cls, psz, psz)       -- per-batch accumulator, resident across i
        i = pl.program_id(1)

        @pl.when(i == 0)
        def _():
            acc_ref[...] = jnp.zeros_like(acc_ref)

        # sigmoid(x) = 0.5*(tanh(0.5*x) + 1)
        #   => sigmoid(a) - sigmoid(b) = 0.5*(tanh(0.5*a) - tanh(0.5*b))
        # (the global 0.25 factor is applied outside the kernel).
        for j in range(cn):  # static unroll; cn is small
            pj = p_ref[j].astype(jnp.float32)                              # (cls, psz, psz)
            oj = o_ref[:, :, j * psz:(j + 1) * psz].astype(jnp.float32)    # (cls, psz, psz)
            d = jnp.tanh(pj * 0.5) - jnp.tanh(oj * 0.5)
            acc_ref[...] += d * d

    return kernel


def final_consist_loss(patch_outputs, output):
    bs = output.shape[0]
    cls = output.shape[1]
    H, W = output.shape[2], output.shape[3]
    psz = patch_outputs.shape[-1]
    cn = W // psz
    assert H == cn * psz and W == cn * psz, "expected square cn*psz spatial dims"
    assert patch_outputs.shape[0] == bs * cn * cn

    kernel = _make_kernel(cn, psz)

    # Sublane granularity of the input dtype (f32 -> 8, bf16 -> 16, int8/fp8 -> 32).
    packing = max(1, 4 // output.dtype.itemsize)
    sub = 8 * packing

    if (psz % sub == 0) or (cn == 1):
        # Fast path: index `output` directly -- no host-side relayout at all.
        # Block = (1, cls, psz, W) window at row offset i*psz of image b.
        o_arr = output
        o_spec = pl.BlockSpec((None, cls, psz, W), lambda b, i: (b, 0, i, 0))
    else:
        # TODO(synk): rare fallback -- a psz-row window of H is not sublane-legal when
        # psz isn't a multiple of the sublane tile, so do one XLA relayout to
        # (bs, cn, cls, psz, W) and index that instead (kernel body unchanged).
        o_arr = output.reshape(bs, cls, cn, psz, W).transpose(0, 2, 1, 3, 4)
        o_spec = pl.BlockSpec((None, None, cls, psz, W), lambda b, i: (b, i, 0, 0, 0))

    # Patch row (b, i, 0..cn-1) is cn consecutive entries of the flat patch dim,
    # i.e. block index b*cn + i with block size cn.  Pure reshape-free indexing.
    p_spec = pl.BlockSpec((cn, cls, psz, psz), lambda b, i: (b * cn + i, 0, 0, 0))

    # Per-batch accumulator: same block for every i (resident across the reduction
    # axis), one HBM writeback per batch element.
    out_spec = pl.BlockSpec((None, cls, psz, psz), lambda b, i: (b, 0, 0, 0))

    n = bs * cls * H * W  # number of paired elements
    block_bytes = cls * psz * W * max(patch_outputs.dtype.itemsize, output.dtype.itemsize)
    # 2 inputs x 2 pipeline buffers + accumulator + slack, clamped to stay well inside
    # physical VMEM on every generation (v7x has 64 MiB total).
    vmem_limit = int(min(max(32 * 2**20, 4 * block_bytes + cls * psz * psz * 4 + 2**20),
                         48 * 2**20))

    partial = pl.pallas_call(
        kernel,
        out_shape=jax.ShapeDtypeStruct((bs, cls, psz, psz), jnp.float32),
        grid=(bs, cn),
        in_specs=[p_spec, o_spec],
        out_specs=out_spec,
        compiler_params=pltpu.CompilerParams(
            dimension_semantics=("parallel", "arbitrary"),
            vmem_limit_bytes=vmem_limit,
        ),
        cost_estimate=pl.CostEstimate(
            flops=6 * n,
            transcendentals=2 * n,
            bytes_accessed=n * (patch_outputs.dtype.itemsize + output.dtype.itemsize)
            + bs * cls * psz * psz * 4,
        ),
    )(patch_outputs, o_arr)

    # 0.25 folds the tanh identity back to squared sigmoid differences;
    # mean over (bs, cls, psz, psz) then sum over (cn, cn) == total sum / (bs*cls*psz*psz).
    return jnp.sum(partial) * (0.25 / float(bs * cls * psz * psz))


def _reference(patch_outputs, output):
    # Pure-JAX reference mirroring the PyTorch forward, for validation.
    bs = output.shape[0]
    cls = output.shape[1]
    psz = patch_outputs.shape[-1]
    cn = output.shape[-1] // psz
    p = patch_outputs.reshape(bs, cn, cn, cls, psz, psz)
    o = output.reshape(bs, cls, cn, psz, cn, psz).transpose(0, 2, 4, 1, 3, 5)
    d = jax.nn.sigmoid(p.astype(jnp.float32)) - jax.nn.sigmoid(o.astype(jnp.float32))
    return jnp.mean(d * d, axis=(0, 3, 4, 5)).sum()


if __name__ == "__main__":
    # Small shapes consistent with the module: bs=2, cls=4, psz=8, cn=2 -> H=W=16
    bs, cls, psz, cn = 2, 4, 8, 2
    H = W = cn * psz
    key = jax.random.PRNGKey(0)
    k1, k2 = jax.random.split(key)
    patch_outputs = jax.random.normal(k1, (bs * cn * cn, cls, psz, psz), jnp.float32)
    output = jax.random.normal(k2, (bs, cls, H, W), jnp.float32)

    loss_fn = jax.jit(final_consist_loss)
    loss = jax.block_until_ready(loss_fn(patch_outputs, output))

    ref = jax.block_until_ready(_reference(patch_outputs, output))
    assert jnp.allclose(loss, ref, rtol=1e-4, atol=1e-6), (loss, ref)

    print("KERNEL_OK")
</pallas_src>

<mosaic_0001>
module attributes {stable_mosaic.version = 11 : i64} {
  func.func @kernel(%arg0: i32, %arg1: i32, %arg2: memref<2x4x8x8xf32, #tpu.memory_space<vmem>>, %arg3: memref<1x4x8x16xf32, #tpu.memory_space<vmem>>, %arg4: memref<1x4x8x8xf32, #tpu.memory_space<vmem>>) attributes {dimension_semantics = [#tpu.dimension_semantics<parallel>, #tpu.dimension_semantics<arbitrary>], iteration_bounds = array<i64: 2, 2>, scalar_prefetch = 0 : i64, scratch_operands = 0 : i64, tpu.core_type = #tpu.core_type<tc>, window_params = [{transform_indices = @transform_0, window_bounds = array<i64: 2, 4, 8, 8>}, {transform_indices = @transform_1, window_bounds = array<i64: 1, 4, 8, 16>}, {transform_indices = @transform_2, window_bounds = array<i64: 1, 4, 8, 8>}]} {
    %c0_i32 = arith.constant 0 : i32
    %0 = arith.cmpi eq, %arg1, %c0_i32 : i32
    %1 = arith.extui %0 : i1 to i32
    %c0_i32_0 = arith.constant 0 : i32
    %2 = arith.cmpi ne, %1, %c0_i32_0 : i32
    scf.if %2 {
      %cst_33 = arith.constant 0.000000e+00 : f32
      %39 = vector.broadcast %cst_33 : f32 to vector<4x8x8xf32>
      %c0_34 = arith.constant 0 : index
      %c0_35 = arith.constant 0 : index
      %c0_36 = arith.constant 0 : index
      %c0_37 = arith.constant 0 : index
      %40 = vector.load %arg4[%c0_34, %c0_35, %c0_36, %c0_37] : memref<1x4x8x8xf32, #tpu.memory_space<vmem>>, vector<1x4x8x8xf32>
      %41 = vector.shape_cast %40 : vector<1x4x8x8xf32> to vector<4x8x8xf32>
      %42 = vector.shape_cast %39 : vector<4x8x8xf32> to vector<1x4x8x8xf32>
      tpu.vector_store %arg4[%c0_34, %c0_35, %c0_36, %c0_37], %42 {strides = array<i32>} : memref<1x4x8x8xf32, #tpu.memory_space<vmem>>, vector<1x4x8x8xf32>,
    } else {
    }
    %c0 = arith.constant 0 : index
    %c0_1 = arith.constant 0 : index
    %c0_2 = arith.constant 0 : index
    %c0_3 = arith.constant 0 : index
    %3 = vector.load %arg2[%c0, %c0_1, %c0_2, %c0_3] : memref<2x4x8x8xf32, #tpu.memory_space<vmem>>, vector<1x4x8x8xf32>
    %4 = vector.shape_cast %3 : vector<1x4x8x8xf32> to vector<4x8x8xf32>
    %c0_4 = arith.constant 0 : index
    %c0_5 = arith.constant 0 : index
    %c0_6 = arith.constant 0 : index
    %c0_7 = arith.constant 0 : index
    %5 = vector.load %arg3[%c0_4, %c0_5, %c0_6, %c0_7] : memref<1x4x8x16xf32, #tpu.memory_space<vmem>>, vector<1x4x8x8xf32>
    %6 = vector.shape_cast %5 : vector<1x4x8x8xf32> to vector<4x8x8xf32>
    %cst = arith.constant 5.000000e-01 : f32
    %7 = vector.broadcast %cst : f32 to vector<4x8x8xf32>
    %8 = arith.mulf %4, %7 : vector<4x8x8xf32>
    %9 = math.tanh %8 : vector<4x8x8xf32>
    %cst_8 = arith.constant 5.000000e-01 : f32
    %10 = vector.broadcast %cst_8 : f32 to vector<4x8x8xf32>
    %11 = arith.mulf %6, %10 : vector<4x8x8xf32>
    %12 = math.tanh %11 : vector<4x8x8xf32>
    %13 = arith.subf %9, %12 : vector<4x8x8xf32>
    %c0_9 = arith.constant 0 : index
    %c0_10 = arith.constant 0 : index
    %c0_11 = arith.constant 0 : index
    %c0_12 = arith.constant 0 : index
    %14 = vector.load %arg4[%c0_9, %c0_10, %c0_11, %c0_12] : memref<1x4x8x8xf32, #tpu.memory_space<vmem>>, vector<1x4x8x8xf32>
    %15 = vector.shape_cast %14 : vector<1x4x8x8xf32> to vector<4x8x8xf32>
    %16 = arith.mulf %13, %13 : vector<4x8x8xf32>
    %17 = arith.addf %15, %16 : vector<4x8x8xf32>
    %c0_13 = arith.constant 0 : index
    %c0_14 = arith.constant 0 : index
    %c0_15 = arith.constant 0 : index
    %c0_16 = arith.constant 0 : index
    %18 = vector.load %arg4[%c0_13, %c0_14, %c0_15, %c0_16] : memref<1x4x8x8xf32, #tpu.memory_space<vmem>>, vector<1x4x8x8xf32>
    %19 = vector.shape_cast %18 : vector<1x4x8x8xf32> to vector<4x8x8xf32>
    %20 = vector.shape_cast %17 : vector<4x8x8xf32> to vector<1x4x8x8xf32>
    tpu.vector_store %arg4[%c0_13, %c0_14, %c0_15, %c0_16], %20 {strides = array<i32>} : memref<1x4x8x8xf32, #tpu.memory_space<vmem>>, vector<1x4x8x8xf32>,
    %c1 = arith.constant 1 : index
    %c0_17 = arith.constant 0 : index
    %c0_18 = arith.constant 0 : index
    %c0_19 = arith.constant 0 : index
    %21 = vector.load %arg2[%c1, %c0_17, %c0_18, %c0_19] : memref<2x4x8x8xf32, #tpu.memory_space<vmem>>, vector<1x4x8x8xf32>
    %22 = vector.shape_cast %21 : vector<1x4x8x8xf32> to vector<4x8x8xf32>
    %c0_20 = arith.constant 0 : index
    %c0_21 = arith.constant 0 : index
    %c0_22 = arith.constant 0 : index
    %c8 = arith.constant 8 : index
    %23 = vector.load %arg3[%c0_20, %c0_21, %c0_22, %c8] : memref<1x4x8x16xf32, #tpu.memory_space<vmem>>, vector<1x4x8x8xf32>
    %24 = vector.shape_cast %23 : vector<1x4x8x8xf32> to vector<4x8x8xf32>
    %cst_23 = arith.constant 5.000000e-01 : f32
    %25 = vector.broadcast %cst_23 : f32 to vector<4x8x8xf32>
    %26 = arith.mulf %22, %25 : vector<4x8x8xf32>
    %27 = math.tanh %26 : vector<4x8x8xf32>
    %cst_24 = arith.constant 5.000000e-01 : f32
    %28 = vector.broadcast %cst_24 : f32 to vector<4x8x8xf32>
    %29 = arith.mulf %24, %28 : vector<4x8x8xf32>
    %30 = math.tanh %29 : vector<4x8x8xf32>
    %31 = arith.subf %27, %30 : vector<4x8x8xf32>
    %c0_25 = arith.constant 0 : index
    %c0_26 = arith.constant 0 : index
    %c0_27 = arith.constant 0 : index
    %c0_28 = arith.constant 0 : index
    %32 = vector.load %arg4[%c0_25, %c0_26, %c0_27, %c0_28] : memref<1x4x8x8xf32, #tpu.memory_space<vmem>>, vector<1x4x8x8xf32>
    %33 = vector.shape_cast %32 : vector<1x4x8x8xf32> to vector<4x8x8xf32>
    %34 = arith.mulf %31, %31 : vector<4x8x8xf32>
    %35 = arith.addf %33, %34 : vector<4x8x8xf32>
    %c0_29 = arith.constant 0 : index
    %c0_30 = arith.constant 0 : index
    %c0_31 = arith.constant 0 : index
    %c0_32 = arith.constant 0 : index
    %36 = vector.load %arg4[%c0_29, %c0_30, %c0_31, %c0_32] : memref<1x4x8x8xf32, #tpu.memory_space<vmem>>, vector<1x4x8x8xf32>
    %37 = vector.shape_cast %36 : vector<1x4x8x8xf32> to vector<4x8x8xf32>
    %38 = vector.shape_cast %35 : vector<4x8x8xf32> to vector<1x4x8x8xf32>
    tpu.vector_store %arg4[%c0_29, %c0_30, %c0_31, %c0_32], %38 {strides = array<i32>} : memref<1x4x8x8xf32, #tpu.memory_space<vmem>>, vector<1x4x8x8xf32>,
    return
  }
  func.func @transform_0(%arg0: i32, %arg1: i32) -> (i32, i32, i32, i32) {
    %c2_i32 = arith.constant 2 : i32
    %0 = arith.muli %arg0, %c2_i32 : i32
    %1 = arith.addi %0, %arg1 : i32
    %c0_i32 = arith.constant 0 : i32
    %c0_i32_0 = arith.constant 0 : i32
    %c0_i32_1 = arith.constant 0 : i32
    %c0_i32_2 = arith.constant 0 : i32
    return %1, %c0_i32, %c0_i32_0, %c0_i32_1 : i32, i32, i32, i32
  }
  func.func @transform_1(%arg0: i32, %arg1: i32) -> (i32, i32, i32, i32) {
    %c0_i32 = arith.constant 0 : i32
    %c0_i32_0 = arith.constant 0 : i32
    %c0_i32_1 = arith.constant 0 : i32
    return %arg0, %c0_i32, %arg1, %c0_i32_0 : i32, i32, i32, i32
  }
  func.func @transform_2(%arg0: i32, %arg1: i32) -> (i32, i32, i32, i32) {
    %c0_i32 = arith.constant 0 : i32
    %c0_i32_0 = arith.constant 0 : i32
    %c0_i32_1 = arith.constant 0 : i32
    %c0_i32_2 = arith.constant 0 : i32
    return %arg0, %c0_i32, %c0_i32_0, %c0_i32_1 : i32, i32, i32, i32
  }
}

</mosaic_0001>

<bundles_post_ra>
// kernel: final_consist_loss.1
= control target key start
LH: loop header
LB: loop body
LE: loop exit
PB: predicated region body
PF: predicated region fallthrough
CT: control target
= control target key end

     0   :  { %s1011_s0 = inlined_call_operand.hbm [shape: f32[8,4,8,8], index: 0, kind: input, shape index: {}]   ;;  %s1012_s1 = inlined_call_operand.hbm [shape: f32[2,4,16,16], index: 1, kind: input, shape index: {}]   ;;  %s1013_s2 = inlined_call_operand.vmem [shape: f32[2,4,8,8], index: 2, kind: output, shape index: {}]  }
   0x1   :  { %1015 = sst [smem:[#allocation10_spill]] %s1011_s0 }
   0x2   :  { %7 = vsyncpa [#allocation3], 0 }
   0x3   :  { %9 = vsyncpa [#allocation3 + $0x1], 0 }
   0x4   :  { %10 = vsyncpa [#allocation5], 0 }
   0x5   :  { %12 = vsyncpa [#allocation5 + $0x1], 0  ;;  %s787_s9 = smov 0   ;;  %s789_s10 = smov 0  }
   0x6   :  { %s791_s11 = smov 0   ;;  %s793_s12 = smov 0  }
   0x7   :  { %s795_s13 = smov 0   ;;  %s797_s14 = smov 0  }
   0x8   :  { %s799_s15 = smov 0   ;;  %s801_s16 = smov 0  }
   0x9   :  { %s803_s17 = smov 0   ;;  %s805_s18 = smov 0  }
   0xa   :  { %s807_s19 = smov 0  }
   0xb LB: > { %1016 = sst [smem:[#allocation8_spill]] %s749_s15  ;;  %s453_s20 = sadd.s32 4294967295, %s765_s19   ;;  %s765_s19 = sphi %s807_s19, %s18_s19   ;;  %s761_s18 = sphi %s805_s18, %s1035_s18   ;;  %s757_s17 = sphi %s803_s17, %s1034_s17   ;;  %s753_s16 = sphi %s801_s16, %s1033_s16   ;;  %s749_s15 = sphi %s799_s15, %s1032_s15   ;;  %s745_s14 = sphi %s797_s14, %s1031_s14   ;;  %s741_s13 = sphi %s795_s13, %s1030_s13   ;;  %s737_s12 = sphi %s793_s12, %s1029_s12   ;;  %s733_s11 = sphi %s791_s11, %s1028_s11   ;;  %s729_s10 = sphi %s789_s10, %s1027_s10   ;;  %s725_s9 = sphi %s787_s9, %s1026_s9  }
   0xc   : > { %s27_s21 = sadd.s32 1, %s757_s17  ;;  %s30_s22 = sadd.s32 1, %s761_s18 }
   0xd   : > { %p28_p0 = scmp.ge.s32.totalorder %s27_s21, 2  ;;  %s455_s23 = sshll.u32 %s761_s18, 1 }
   0xe   : > { %s41_s24 = sadd.s32 1, %s745_s14  ;;  %s35_s25 = sadd.s32 %s757_s17, %s455_s23 }
   0xf   : > { %s1037_s21 = smov (%p28_p0, %s27_s21), 0  ;;  %s1039_s22 = smov (!%p28_p0, %s30_s22), %s761_s18 }
  0x10   : > { %p48_p1 = scmp.ne.s32.totalorder %s745_s14, %s741_s13  ;;  %p32_p2 = scmp.ge.s32.totalorder %s1039_s22, 2 }
  0x11   : > { %p49_p3 = scmp.eq.s32.totalorder %s765_s19, 0  ;;  %p54_p4 = scmp.ne.s32.totalorder %s741_s13, %s737_s12 }
  0x12   : > { %p853_p5 = scmp.eq.s32.totalorder %s453_s20, 0  ;;  %s1041_s22 = smov (%p32_p2, %s1039_s22), 0 }
  0x13   : > { %1018 = sst [smem:[#allocation9_spill]] %s1041_s22  ;;  %p861_p6 = por %p49_p3, %p48_p1 }
  0x14   : > { %p867_p7 = por %p853_p5, %p54_p4  ;;  %s456_s29 = sshll.u32 %s1041_s22, 1 }
  0x15   : > { %s64_s30 = ssub.s32 %s761_s18, %s1041_s22  ;;  %s37_s3 = sadd.s32 %s456_s29, %s1037_s21 }
  0x16   : > { %s65_s4 = ssub.s32 %s757_s17, %s1037_s21  ;;  %s38_s5 = ssub.s32 %s35_s25, %s37_s3 }
  0x17   : > { %s66_s6 = sor.u32 %s65_s4, %s64_s30  ;;  %p39_p8 = scmp.eq.s32.totalorder %s38_s5, 0 }
  0x18   : > { %p67_p9 = scmp.eq.s32.totalorder %s66_s6, 0  ;;  %p493_p10 = scmp.lt.s32.totalorder %s765_s19, 4 }
  0x19   : > { %s879_s7 = scalar_select %p39_p8, %s745_s14, %s41_s24  }
  0x1a   : > { %s132_s8 = sand.u32 1, %s745_s14   ;;  %s480_s12 = sshll.u32 %s35_s25, 6 }
  0x1b   : > { %s459_s20 = sshll.u32 %s132_s8, 6  ;;  %s1021_s0 = sld [smem:[#allocation10_spill]] }
  0x1c   : > { %s136_s30 = scalar_lea.vmem [#allocation2], %s459_s20  ;;  %p487_p11 = pnand %p493_p10, %p861_p6 }
  0x1d   : > { %s147_s4 = sshll.u32 %s136_s30, 4  ;;  %p467_p12 = scmp.ge.s32.totalorder %s765_s19, 1  ;;  %s148_s4 = int_to_ptr.vmem [resolvable:$true] %s147_s4 }
  0x1e   : > { %p178_p13 = scmp.lt.s32.totalorder %s765_s19, 5  ;;  %s133_s15 = scalar_lea.sflag [#allocation3], %s132_s8 }
  0x1f   : > { %s767_s24 = smov 128   ;;  %s768_s25 = smov 8  }
  0x20   : > { %p891_p0 = pnand %p467_p12, %p178_p13  ;;  %p76_p1 = scmp.ne.s32.totalorder %s733_s11, %s729_s10 }
  0x21   : > { %s144_s29 = scalar_lea.hbm %s1021_s0, %s480_s12  ;;  %s69_s12 = sadd.s32 1, %s733_s11 }
  0x22   : > { %s145_s3 = sshll.u32 %s144_s29, 4  ;;  %p82_p2 = scmp.ne.s32.totalorder %s729_s10, %s725_s9  ;;  %s146_s3 = int_to_ptr.hbm [resolvable:$true] %s145_s3 }
  0x23   : > { %489 = dma.hbm_to_vmem [thread:$0]  (!%p487_p11), %s146_s3, 1024, %s148_s4, %s133_s15, %s767_s24, %s767_s24, %s768_s25  }
  0x24   : > { %s898_s20 = scalar_select %p67_p9, %s733_s11, %s69_s12  }
  0x25   : > { %s157_s27 = sand.u32 1, %s733_s11   ;;  %s465_s23 = sshll.u32 %s761_s18, 3 }
  0x26   : > { %p78_p4 = por %p76_p1, %p49_p3  ;;  %p910_p6 = por %p82_p2, %p853_p5 }
  0x27   : > { %s464_s29 = sshll.u32 %s157_s27, 5  ;;  %s165_s3 = sadd.s32 %s757_s17, %s465_s23 }
  0x28   : > { %s466_s30 = sshll.u32 %s165_s3, 3  ;;  %s161_s4 = scalar_lea.vmem [#allocation4], %s464_s29 }
  0x29   : > { %s170_s15 = sshll.u32 %s161_s4, 4  ;;  %s167_s12 = scalar_lea.hbm %s1012_s1, %s466_s30  ;;  %s171_s15 = int_to_ptr.vmem [resolvable:$true] %s170_s15 }
  0x2a   : > { %s168_s9 = sshll.u32 %s167_s12, 4  ;;  %p490_p8 = pnand %p493_p10, %p78_p4  ;;  %s169_s9 = int_to_ptr.hbm [resolvable:$true] %s168_s9 }
  0x2b   : > { %s158_s22 = scalar_lea.sflag [#allocation5], %s157_s27  ;;  %s769_s26 = smov 256  }
  0x2c   : > { %492 = dma.hbm_to_vmem [thread:$0]  (!%p490_p8), %s169_s9, 512, %s171_s15, %s158_s22, %s769_s26, %s767_s24, %s768_s25  }
  0x2d   : > { %182 = sbr.rel (%p891_p0) target bundleno = 214 (0xd6), region = 28  ;;  %s184_s23 = sand.u32 (!%p891_p0), 1, %s741_s13  }
  0x2e   : > { %s468_s29 = sshll.u32 (!%p891_p0), %s184_s23, 6  ;;  %s185_s3 = scalar_lea.sflag (!%p891_p0), [#allocation3], %s184_s23 }
  0x2f   : > { %s923_s4 = scalar_lea.vmem (!%p891_p0), [#allocation2], %s468_s29 }
  0x32   : > { %716 = dma.done.wait (%p867_p7), %s185_s3, 1024  }
  0x33   : > { %718 = vsyncadd (%p867_p7), %s185_s3, 4294966272  ;;  %s194_s0 = sand.u32 1, %s729_s10  }
  0x34   : > { %s469_s27 = sshll.u32 %s194_s0, 5  ;;  %s195_s22 = scalar_lea.sflag [#allocation5], %s194_s0 }
  0x35   : > { %s198_s24 = scalar_lea.vmem [#allocation4], %s469_s27 }
  0x36   : > { %720 = dma.done.wait (%p910_p6), %s195_s22, 512  }
  0x37   : > { %722 = vsyncadd (%p910_p6), %s195_s22, 4294966784  ;;  %p228_p3 = scmp.lt.s32.totalorder %s753_s16, 1  ;;  %s1024_s15 = sld [smem:[#allocation8_spill]] }
  0x39   : > { %s1043_s16 = smov (!%p228_p3, %s753_s16), 1 }
  0x3a   : > { %s481_s25 = sshll.u32 %s1043_s16, 5 }
  0x3b   : > { %s939_s28 = scalar_lea.vmem %s1013_s2, %s481_s25 }
  0x3d   : > { %p472_p5 = scmp.ne.s32.totalorder %s1024_s15, 0 }
  0x3f   : > { %236 = sbr.rel (%p472_p5) target bundleno = 73 (0x49), region = 40 }
  0x44   : > { %vm237_vm0 = vcmask 64512   ;;  %v770_v0 = vmov 0.0  }
  0x45   : > { %238 = vst.msk [vmem:[%s939_s28] sm:$0xff] %vm237_vm0, %v770_v0 }
  0x46   : > { %239 = vst.msk [vmem:[%s939_s28 + $0x8] sm:$0xff] %vm237_vm0, %v770_v0 }
  0x47   : > { %240 = vst.msk [vmem:[%s939_s28 + $0x10] sm:$0xff] %vm237_vm0, %v770_v0 }
  0x48   : > { %241 = vst.msk [vmem:[%s939_s28 + $0x18] sm:$0xff] %vm237_vm0, %v770_v0 }
  0x49 PF: > { %v294_v1 = vld [vmem:[%s198_s24 + $0x10] sm:$0xff]  ;;  %v292_v2 = vld [vmem:[%s198_s24] sm:$0xff]  ;;  %v295_v5 = vld [vmem:[%s198_s24 + $0x18] sm:$0xff]  ;;  %s771_s16 = smov 120   ;;  %vm282_vm1 = vcmask 64512  }
  0x4a   : > { %v306_v3 = vmul.f32 0.5, %v294_v1  ;;  %v304_v4 = vmul.f32 0.5, %v292_v2  ;;  %v293_v6 = vld [vmem:[%s198_s24 + $0x8] sm:$0xff]  ;;  %v307_v7 = vmul.f32 0.5, %v295_v5  ;;  %v244_v13 = vld [vmem:[%s923_s4 + $0x10] sm:$0xff]  ;;  %v242_v14 = vld [vmem:[%s923_s4] sm:$0xff] }
  0x4b   : > { %v305_v8 = vmul.f32 0.5, %v293_v6  ;;  %v252_v15 = vmul.f32 0.5, %v244_v13  ;;  %v250_v16 = vmul.f32 0.5, %v242_v14  ;;  %v245_v17 = vld [vmem:[%s923_s4 + $0x18] sm:$0xff]  ;;  %v243_v18 = vld [vmem:[%s923_s4 + $0x8] sm:$0xff]  ;;  %v475_v41 = vld [vmem:[%s923_s4 + $0x30] sm:$0xff] }
  0x4c   : > { %587 = vtanh.f32 %v306_v3  ;;  %v253_v20 = vmul.f32 0.5, %v245_v17  ;;  %v251_v21 = vmul.f32 0.5, %v243_v18  ;;  %v270_v27 = vld [vmem:[%s939_s28] sm:$0xff]  ;;  %v298_v43 = vmul.f32 0.5, %v475_v41  ;;  %v476_v45 = vld [vmem:[%s923_s4 + $0x38] sm:$0xff]  ;;  %v474_v46 = vld [vmem:[%s923_s4 + $0x28] sm:$0xff] }
  0x4d   : > { %589 = vtanh.f32 %v304_v4  ;;  %v271_v37 = vld [vmem:[%s939_s28 + $0x8] sm:$0xff]  ;;  %v473_v42 = vld [vmem:[%s923_s4 + $0x20] sm:$0xff]  ;;  %v299_v47 = vmul.f32 0.5, %v476_v45  ;;  %v297_v48 = vmul.f32 0.5, %v474_v46 }
  0x4e   : > { %591 = vtanh.f32 %v307_v7  ;;  %v272_v26 = vld [vmem:[%s939_s28 + $0x10] sm:$0xff]  ;;  %v296_v44 = vmul.f32 0.5, %v473_v42 }
  0x4f   : > { %593 = vtanh.f32 %v305_v8  ;;  %v273_v36 = vld [vmem:[%s939_s28 + $0x18] sm:$0xff] }
  0x50   : > { %595 = vtanh.f32 %v252_v15 }
  0x51   : > { %597 = vtanh.f32 %v250_v16 }
  0x52   : > { %v588_v9 = vpop.eup %587  ;;  %599 = vtanh.f32 %v253_v20 }
  0x53   : > { %v590_v10 = vpop.eup %589  ;;  %320 = vrot.lane.b32.xlu1 %v588_v9, %s771_s16  ;;  %601 = vtanh.f32 %v251_v21 }
  0x54   : > { %316 = vrot.lane.b32.xlu0 %v590_v10, %s771_s16  ;;  %v592_v11 = vpop.eup %591  ;;  %603 = vtanh.f32 %v298_v43 }
  0x55   : > { %v594_v12 = vpop.eup %593  ;;  %605 = vtanh.f32 %v296_v44 }
  0x56   : > { %v596_v19 = vpop.eup %595  ;;  %607 = vtanh.f32 %v299_v47 }
  0x57   : > { %v598_v22 = vpop.eup %597  ;;  %v268_v23 = vsub.f32 %v596_v19, %v588_v9  ;;  %609 = vtanh.f32 %v297_v48 }
  0x58   : > { %v266_v24 = vsub.f32 %v598_v22, %v590_v10  ;;  %v600_v31 = vpop.eup %599 }
  0x59   : > { %v276_v25 = vmul.f32 %v268_v23, %v268_v23  ;;  %v602_v32 = vpop.eup %601  ;;  %v269_v33 = vsub.f32 %v600_v31, %v592_v11 }
  0x5a   : > { %v274_v28 = vmul.f32 %v266_v24, %v266_v24  ;;  %v267_v34 = vsub.f32 %v602_v32, %v594_v12  ;;  %v604_v49 = vpop.eup %603 }
  0x5b   : > { %322 = vrot.lane.b32.xlu1 %v592_v11, %s771_s16  ;;  %v280_v29 = vadd.f32 %v276_v25, %v272_v26  ;;  %v277_v35 = vmul.f32 %v269_v33, %v269_v33  ;;  %v606_v50 = vpop.eup %605 }
  0x5c   : > { %318 = vrot.lane.b32.xlu0 %v594_v12, %s771_s16  ;;  %v278_v30 = vadd.f32 %v274_v28, %v270_v27  ;;  %v275_v38 = vmul.f32 %v267_v34, %v267_v34  ;;  %v608_v60 = vpop.eup %607 }
  0x5d   : > { %285 = vst.msk [vmem:[%s939_s28 + $0x10] sm:$0xff] %vm282_vm1, %v280_v29  ;;  %v281_v39 = vadd.f32 %v277_v35, %v273_v36  ;;  %v610_v62 = vpop.eup %609 }
  0x5e   : > { %283 = vst.msk [vmem:[%s939_s28] sm:$0xff] %vm282_vm1, %v278_v30  ;;  %v279_v40 = vadd.f32 %v275_v38, %v271_v37 }
  0x5f   : > { %286 = vst.msk [vmem:[%s939_s28 + $0x18] sm:$0xff] %vm282_vm1, %v281_v39 }
  0x60   : > { %284 = vst.msk [vmem:[%s939_s28 + $0x8] sm:$0xff] %vm282_vm1, %v279_v40 }
  0x64   : > { %v334_v54 = vld [vmem:[%s939_s28 + $0x10] sm:$0xff] }
  0x65   : > { %v332_v57 = vld [vmem:[%s939_s28] sm:$0xff] }
  0x66   : > { %v335_v2 = vld [vmem:[%s939_s28 + $0x18] sm:$0xff] }
  0x67   : > { %v333_v5 = vld [vmem:[%s939_s28 + $0x8] sm:$0xff] }
  0xc5   : > { %v321_v51 = vpop.permute.xlu1 %320 }
  0xc6   : > { %v330_v52 = vsub.f32 %v604_v49, %v321_v51  ;;  %v317_v53 = vpop.permute.xlu0 %316 }
  0xc7   : > { %v328_v55 = vsub.f32 %v606_v50, %v317_v53 }
  0xc8   : > { %v338_v56 = vmul.f32 %v330_v52, %v330_v52 }
  0xc9   : > { %v336_v58 = vmul.f32 %v328_v55, %v328_v55 }
  0xca   : > { %v342_v59 = vadd.f32 %v338_v56, %v334_v54 }
  0xcb   : > { %v340_v61 = vadd.f32 %v336_v58, %v332_v57 }
  0xcc   : > { %346 = vst.msk [vmem:[%s939_s28 + $0x10] sm:$0xff] %vm282_vm1, %v342_v59 }
  0xcd   : > { %344 = vst.msk [vmem:[%s939_s28] sm:$0xff] %vm282_vm1, %v340_v61  ;;  %v323_v63 = vpop.permute.xlu1 %322 }
  0xce   : > { %v331_v0 = vsub.f32 %v608_v60, %v323_v63  ;;  %v319_v1 = vpop.permute.xlu0 %318 }
  0xcf   : > { %v329_v3 = vsub.f32 %v610_v62, %v319_v1 }
  0xd0   : > { %v339_v4 = vmul.f32 %v331_v0, %v331_v0 }
  0xd1   : > { %v337_v6 = vmul.f32 %v329_v3, %v329_v3 }
  0xd2   : > { %v343_v7 = vadd.f32 %v339_v4, %v335_v2 }
  0xd3   : > { %v341_v8 = vadd.f32 %v337_v6, %v333_v5 }
  0xd4   : > { %347 = vst.msk [vmem:[%s939_s28 + $0x18] sm:$0xff] %vm282_vm1, %v343_v7 }
  0xd5   : > { %345 = vst.msk [vmem:[%s939_s28 + $0x8] sm:$0xff] %vm282_vm1, %v341_v8 }
  0xd6 PF: > { %s18_s19 = sadd.s32 1, %s765_s19   ;;  %s1025_s8 = sld [smem:[#allocation9_spill]] }
  0xd7   : > { %p15_p7 = scmp.ge.s32.totalorder %s18_s19, 6   ;;  %s1026_s9 = smov %s729_s10 }
  0xd8   : > { %s1027_s10 = smov %s733_s11  ;;  %s1028_s11 = smov %s898_s20 }
  0xd9   : > { %s1029_s12 = smov %s741_s13  ;;  %s1030_s13 = smov %s745_s14 }
  0xda   : > { %s1031_s14 = smov %s879_s7  ;;  %s1032_s15 = smov %s757_s17 }
  0xdb   : > { %s1033_s16 = smov %s761_s18  ;;  %s1034_s17 = smov %s1037_s21 }
  0xdc   : > { %s1035_s18 = smov %s1025_s8  ;;  %17 = sbr.rel (!%p15_p7) target bundleno = 11 (0xb), region = 86 }
  0xe1   :  { %369 = vsyncpa [#allocation3], 1 }
  0xe2   :  { %371 = vsyncpa [#allocation3 + $0x1], 1 }
  0xe3   :  { %372 = vsyncpa [#allocation5], 1 }
  0xe4   :  { %374 = vsyncpa [#allocation5 + $0x1], 1 }

</bundles_post_ra>
